<compile_context>
chip_gen: v6e
topology: v6e:2x2x1
jax: 0.10.0
libtpu: 0.0.40
codegen_flags: <defaults>
</compile_context>

<pallas_src>
import functools
import math

import jax
import jax.numpy as jnp
from jax.experimental import pallas as pl
from jax.experimental.pallas import tpu as pltpu


# ---------------------------------------------------------------------------
# Fused kernel: preprocess + num_stacks LSTM cells + Linear + in-place update.
# ---------------------------------------------------------------------------
def _fused_step_kernel(lr_ref, g_ref, x_ref, hc_ref, *rest,
                       p, hidden, num_stacks, output_scale, preprocess):
    L, H = num_stacks, hidden
    n_w = 3 * L
    layer_refs = rest[:n_w]                       # (w_ih_t, w_hh_t, b) per layer
    wlin_ref, blin_ref = rest[n_w], rest[n_w + 1]
    x_out_ref, hc_out_ref = rest[n_w + 2], rest[n_w + 3]

    g = g_ref[...]
    if preprocess:
        # LogAndSign preprocessing, kept entirely in vregs.
        # NOTE: the PyTorch source does torch.exp(torch.Tensor(p)) — an
        # UNINITIALIZED tensor of size p (a bug). Intended semantics is the
        # scalar exp(p); we implement that (documented deviation).
        logp = jnp.clip(jnp.log(jnp.abs(g)) * (1.0 / p), -1.0, 1.0)
        signp = jnp.clip(math.exp(p) * g, -1.0, 1.0)
        inp = jnp.concatenate([logp, signp], axis=-1)     # [tb, 2I]
    else:
        inp = g

    # Packed recurrent state: [h_0 ... h_{L-1} | c_0 ... c_{L-1}], one dense
    # 128-lane load per tile (for L=2, H=32).
    hc = hc_ref[...]

    h_list, c_list = [], []
    for layer in range(L):
        w_ih_ref = layer_refs[3 * layer]          # [in_dim, 4H]
        w_hh_ref = layer_refs[3 * layer + 1]      # [H, 4H]
        b_ref = layer_refs[3 * layer + 2]         # [1, 4H]
        h_prev = hc[:, layer * H:(layer + 1) * H]
        c_prev = hc[:, (L + layer) * H:(L + layer + 1) * H]

        # Two small MXU passes sharing the f32 accumulator (no concat scratch).
        gates = (jnp.dot(inp, w_ih_ref[...], preferred_element_type=jnp.float32)
                 + jnp.dot(h_prev, w_hh_ref[...],
                           preferred_element_type=jnp.float32)
                 + b_ref[...])

        # g-gate columns were pre-scaled by 2 at init, so tanh(z)=2*sig(2z)-1
        # lets a single full-width (4H == 128 lane) sigmoid cover all gates.
        sig = jax.nn.sigmoid(gates)
        i_g = sig[:, 0 * H:1 * H]                 # PyTorch gate order i, f, g, o
        f_g = sig[:, 1 * H:2 * H]
        g_g = 2.0 * sig[:, 2 * H:3 * H] - 1.0
        o_g = sig[:, 3 * H:4 * H]

        c_new = f_g * c_prev + i_g * g_g
        h_new = o_g * jnp.tanh(c_new)
        h_list.append(h_new)
        c_list.append(c_new)
        inp = h_new                               # stays in vregs between layers

    # update = Linear(h_top) * output_scale * lr ;  x_out = x + update
    # TODO(synk): update.retain_grad() is an autograd-only hook; no forward op.
    upd = (jnp.dot(inp, wlin_ref[...], preferred_element_type=jnp.float32)
           + blin_ref[...])
    x_out_ref[...] = x_ref[...] + upd * (output_scale * lr_ref[0])

    # One dense (128-lane for L=2,H=32) state writeback per tile.
    hc_out_ref[...] = jnp.concatenate(h_list + c_list, axis=-1)


def _pick_batch_tile(batch):
    """Largest batch tile (multiple of 8, <= 2048 rows) dividing `batch`.

    For large batches we keep >= 2 grid steps so the "parallel" grid axis can
    be sharded across v7x's two TensorCores.
    """
    if batch <= 1024:
        return batch
    for tb in (2048, 1024, 512, 256, 128, 64, 32, 16, 8):
        if batch % tb == 0 and batch // tb >= 2:
            return tb
    return batch


# ---------------------------------------------------------------------------
# Forward pass — matches LSTM_BlackBox_Optimizee_Model_lr.forward semantics.
# ---------------------------------------------------------------------------
def forward(params, x, input_gradients, prev_state, step, *,
            p=10, output_scale=1.0, preprocess=True):
    B, I = input_gradients.shape
    O = x.shape[1]
    h_prev, c_prev = prev_state                   # [L, B, H] each
    L, _, H = h_prev.shape
    state_w = 2 * L * H

    # lr = 0.01 * 0.96**step  (jnp-based so a traced `step` works too).
    lr = (0.01 * jnp.power(jnp.float32(0.96),
                           jnp.asarray(step, jnp.float32)))
    lr = lr.astype(jnp.float32).reshape(1)

    # Wrapper-side layout plumbing: pack (h, c) as [B, 2*L*H] so the kernel's
    # state load/store is a single lane-dense row per tile.
    # TODO(synk): in a real L2O loop carry the state packed as [B, 2LH] (and
    # optionally in bf16) between steps to avoid these transposes entirely.
    hc_prev = jnp.concatenate(
        [jnp.transpose(h_prev, (1, 0, 2)).reshape(B, L * H),
         jnp.transpose(c_prev, (1, 0, 2)).reshape(B, L * H)], axis=-1)

    tb = _pick_batch_tile(B)
    grid = (B // tb,)

    flat_lstm = []
    for arrs in params["lstm"]:
        flat_lstm += list(arrs)

    in_specs = [pl.BlockSpec(memory_space=pltpu.MemorySpace.SMEM)]     # lr
    in_specs += [pl.BlockSpec((tb, I), lambda i: (i, 0)),              # grads
                 pl.BlockSpec((tb, O), lambda i: (i, 0)),              # x
                 pl.BlockSpec((tb, state_w), lambda i: (i, 0))]        # hc_prev
    for w in flat_lstm:                                                # weights
        in_specs.append(pl.BlockSpec(w.shape, lambda i: (0, 0)))
    in_specs += [pl.BlockSpec(params["lin_w_t"].shape, lambda i: (0, 0)),
                 pl.BlockSpec(params["lin_b"].shape, lambda i: (0, 0))]

    out_shape = [jax.ShapeDtypeStruct((B, O), jnp.float32),
                 jax.ShapeDtypeStruct((B, state_w), jnp.float32)]
    out_specs = [pl.BlockSpec((tb, O), lambda i: (i, 0)),
                 pl.BlockSpec((tb, state_w), lambda i: (i, 0))]

    # Advisory cost estimate for the XLA scheduler.
    in0 = 2 * I if preprocess else I
    weight_bytes = 4 * (sum(int(w.size) for w in flat_lstm)
                        + int(params["lin_w_t"].size)
                        + int(params["lin_b"].size))
    flops = 2 * B * ((in0 + H) * 4 * H + max(L - 1, 0) * (2 * H) * 4 * H
                     + H * O) + B * (10 * L * H + 4 * O)
    transcendentals = B * (L * 5 * H + (I if preprocess else 0))
    bytes_accessed = 4 * B * (I + 2 * O + 2 * state_w) + weight_bytes
    cost = pl.CostEstimate(flops=flops, transcendentals=transcendentals,
                           bytes_accessed=bytes_accessed)

    # Explicit VMEM limit only when the tile is large (headroom on v7x 64 MiB).
    vmem_limit = (48 << 20) if tb > 512 else None

    kernel = functools.partial(
        _fused_step_kernel, p=float(p), hidden=H, num_stacks=L,
        output_scale=float(output_scale), preprocess=bool(preprocess))

    x_out, hc_out = pl.pallas_call(
        kernel,
        grid=grid,
        in_specs=in_specs,
        out_specs=out_specs,
        out_shape=out_shape,
        input_output_aliases={2: 0},              # x updated in place (P8)
        cost_estimate=cost,
        compiler_params=pltpu.CompilerParams(
            dimension_semantics=("parallel",),
            vmem_limit_bytes=vmem_limit),
    )(lr, input_gradients, x, hc_prev, *flat_lstm,
      params["lin_w_t"], params["lin_b"])

    # Unpack the lane-dense state back to the module's (L, B, H) layout.
    h_out = jnp.transpose(hc_out[:, :L * H].reshape(B, L, H), (1, 0, 2))
    c_out = jnp.transpose(hc_out[:, L * H:].reshape(B, L, H), (1, 0, 2))
    return x_out, (h_out, c_out)


# ---------------------------------------------------------------------------
# Parameter init (deterministic; mirrors PyTorch's U(-1/sqrt(H), 1/sqrt(H))).
# Weights are stored kernel-ready: transposed ([in, 4H]) and with the g-gate
# (cell-candidate) rows scaled by 2 so the kernel can use tanh(z)=2*sig(2z)-1.
# ---------------------------------------------------------------------------
def init_params(key, input_size, output_size, hidden_size, num_stacks,
                input_flag=2):
    k = 1.0 / math.sqrt(hidden_size)
    H = hidden_size
    params = {"lstm": []}
    for layer in range(num_stacks):
        in_dim = input_size * input_flag if layer == 0 else hidden_size
        key, k1, k2, k3, k4 = jax.random.split(key, 5)
        w_ih = jax.random.uniform(k1, (4 * H, in_dim), jnp.float32, -k, k)
        w_hh = jax.random.uniform(k2, (4 * H, H), jnp.float32, -k, k)
        b_ih = jax.random.uniform(k3, (4 * H,), jnp.float32, -k, k)
        b_hh = jax.random.uniform(k4, (4 * H,), jnp.float32, -k, k)
        scale = jnp.ones((4 * H, 1), jnp.float32).at[2 * H:3 * H].set(2.0)
        w_ih_t = jnp.transpose(w_ih * scale)       # [in_dim, 4H]
        w_hh_t = jnp.transpose(w_hh * scale)       # [H, 4H]
        b = ((b_ih + b_hh) * scale[:, 0]).reshape(1, 4 * H)
        params["lstm"].append((w_ih_t, w_hh_t, b))
    key, k5, k6 = jax.random.split(key, 3)
    w_lin = jax.random.uniform(k5, (output_size, hidden_size),
                               jnp.float32, -k, k)
    b_lin = jax.random.uniform(k6, (output_size,), jnp.float32, -k, k)
    params["lin_w_t"] = jnp.transpose(w_lin)       # [H, O]
    params["lin_b"] = b_lin.reshape(1, output_size)
    return params


# ---------------------------------------------------------------------------
# Pure-JAX reference (canonical tanh LSTM; undoes the *2 g-gate scaling).
# ---------------------------------------------------------------------------
def _reference_forward(params, x, input_gradients, prev_state, step, *,
                       p=10, output_scale=1.0, preprocess=True):
    hp = jax.lax.Precision.HIGHEST
    if preprocess:
        logp = jnp.clip(jnp.log(jnp.abs(input_gradients)) / p, -1.0, 1.0)
        signp = jnp.clip(math.exp(p) * input_gradients, -1.0, 1.0)
        feat = jnp.concatenate([logp, signp], axis=-1)
    else:
        feat = input_gradients
    lr = 0.01 * (0.96 ** step)
    h_prev, c_prev = prev_state
    H = h_prev.shape[-1]
    hs, cs = [], []
    inp = feat
    for layer, (w_ih_t, w_hh_t, b) in enumerate(params["lstm"]):
        gates = (jnp.dot(inp, w_ih_t, precision=hp)
                 + jnp.dot(h_prev[layer], w_hh_t, precision=hp) + b)
        i_g = jax.nn.sigmoid(gates[:, 0:H])
        f_g = jax.nn.sigmoid(gates[:, H:2 * H])
        g_g = jnp.tanh(0.5 * gates[:, 2 * H:3 * H])   # undo the *2 scaling
        o_g = jax.nn.sigmoid(gates[:, 3 * H:4 * H])
        c = f_g * c_prev[layer] + i_g * g_g
        h = o_g * jnp.tanh(c)
        hs.append(h)
        cs.append(c)
        inp = h
    upd = jnp.dot(inp, params["lin_w_t"], precision=hp) + params["lin_b"]
    x_out = x + upd * (output_scale * lr)
    return x_out, (jnp.stack(hs, 0), jnp.stack(cs, 0))


if __name__ == "__main__":
    # Small shapes consistent with the module.
    input_size, output_size = 10, 10
    hidden_size, num_stacks = 32, 2
    batchsize = 16
    p, output_scale = 10, 1.0

    key = jax.random.PRNGKey(0)
    k_params, k_x, k_g = jax.random.split(key, 3)

    params = init_params(k_params, input_size, output_size, hidden_size,
                         num_stacks)
    x = jax.random.normal(k_x, (batchsize, output_size), jnp.float32)
    input_gradients = 0.1 * jax.random.normal(
        k_g, (batchsize, input_size), jnp.float32)

    # prev_state is None in torch -> zeros [num_stacks, batch, hidden].
    prev_state = (jnp.zeros((num_stacks, batchsize, hidden_size), jnp.float32),
                  jnp.zeros((num_stacks, batchsize, hidden_size), jnp.float32))

    # Reference computed first (kernel output 0 aliases the x buffer).
    x_ref, (h_ref, c_ref) = _reference_forward(
        params, x, input_gradients, prev_state, 3,
        p=p, output_scale=output_scale)

    fwd = jax.jit(functools.partial(forward, p=p, output_scale=output_scale,
                                    preprocess=True))
    x_new, next_state = fwd(params, x, input_gradients, prev_state, 3)
    jax.block_until_ready((x_new, next_state))

    assert x_new.shape == (batchsize, output_size)
    assert next_state[0].shape == (num_stacks, batchsize, hidden_size)
    assert next_state[1].shape == (num_stacks, batchsize, hidden_size)

    assert bool(jnp.allclose(x_new, x_ref, atol=1e-2, rtol=1e-2))
    assert bool(jnp.allclose(next_state[0], h_ref, atol=1e-2, rtol=1e-2))
    assert bool(jnp.allclose(next_state[1], c_ref, atol=1e-2, rtol=1e-2))
    print("KERNEL_OK")
</pallas_src>

<mosaic_0001>
module attributes {stable_mosaic.version = 11 : i64} {
  func.func @_fused_step_kernel(%arg0: i32, %arg1: memref<1xf32, #tpu.memory_space<smem>>, %arg2: memref<16x10xf32, #tpu.memory_space<vmem>>, %arg3: memref<16x10xf32, #tpu.memory_space<vmem>>, %arg4: memref<16x128xf32, #tpu.memory_space<vmem>>, %arg5: memref<20x128xf32, #tpu.memory_space<vmem>>, %arg6: memref<32x128xf32, #tpu.memory_space<vmem>>, %arg7: memref<1x128xf32, #tpu.memory_space<vmem>>, %arg8: memref<32x128xf32, #tpu.memory_space<vmem>>, %arg9: memref<32x128xf32, #tpu.memory_space<vmem>>, %arg10: memref<1x128xf32, #tpu.memory_space<vmem>>, %arg11: memref<32x10xf32, #tpu.memory_space<vmem>>, %arg12: memref<1x10xf32, #tpu.memory_space<vmem>>, %arg13: memref<16x10xf32, #tpu.memory_space<vmem>>, %arg14: memref<16x128xf32, #tpu.memory_space<vmem>>) attributes {dimension_semantics = [#tpu.dimension_semantics<parallel>], iteration_bounds = array<i64: 1>, scalar_prefetch = 0 : i64, scratch_operands = 0 : i64, tpu.core_type = #tpu.core_type<tc>, window_params = [{transform_indices = @transform_0, window_bounds = array<i64: 1>}, {transform_indices = @transform_1, window_bounds = array<i64: 16, 10>}, {transform_indices = @transform_2, window_bounds = array<i64: 16, 10>}, {transform_indices = @transform_3, window_bounds = array<i64: 16, 128>}, {pipeline_mode = #tpu.pipeline_mode<synchronous>, transform_indices = @transform_4, window_bounds = array<i64: 20, 128>}, {pipeline_mode = #tpu.pipeline_mode<synchronous>, transform_indices = @transform_5, window_bounds = array<i64: 32, 128>}, {pipeline_mode = #tpu.pipeline_mode<synchronous>, transform_indices = @transform_6, window_bounds = array<i64: 1, 128>}, {pipeline_mode = #tpu.pipeline_mode<synchronous>, transform_indices = @transform_7, window_bounds = array<i64: 32, 128>}, {pipeline_mode = #tpu.pipeline_mode<synchronous>, transform_indices = @transform_8, window_bounds = array<i64: 32, 128>}, {pipeline_mode = #tpu.pipeline_mode<synchronous>, transform_indices = @transform_9, window_bounds = array<i64: 1, 128>}, {pipeline_mode = #tpu.pipeline_mode<synchronous>, transform_indices = @transform_10, window_bounds = array<i64: 32, 10>}, {pipeline_mode = #tpu.pipeline_mode<synchronous>, transform_indices = @transform_11, window_bounds = array<i64: 1, 10>}, {transform_indices = @transform_12, window_bounds = array<i64: 16, 10>}, {transform_indices = @transform_13, window_bounds = array<i64: 16, 128>}]} {
    %c0 = arith.constant 0 : index
    %c0_0 = arith.constant 0 : index
    %0 = vector.load %arg2[%c0, %c0_0] : memref<16x10xf32, #tpu.memory_space<vmem>>, vector<16x10xf32>
    %1 = math.absf %0 : vector<16x10xf32>
    %2 = math.log %1 : vector<16x10xf32>
    %cst = arith.constant 1.000000e-01 : f32
    %3 = vector.broadcast %cst : f32 to vector<16x10xf32>
    %4 = arith.mulf %2, %3 : vector<16x10xf32>
    %cst_1 = arith.constant -1.000000e+00 : f32
    %cst_2 = arith.constant 1.000000e+00 : f32
    %5 = vector.broadcast %cst_1 : f32 to vector<16x10xf32>
    %6 = arith.maximumf %5, %4 : vector<16x10xf32>
    %7 = vector.broadcast %cst_2 : f32 to vector<16x10xf32>
    %8 = arith.minimumf %7, %6 : vector<16x10xf32>
    %cst_3 = arith.constant 22026.4648 : f32
    %9 = vector.broadcast %cst_3 : f32 to vector<16x10xf32>
    %10 = arith.mulf %9, %0 : vector<16x10xf32>
    %cst_4 = arith.constant -1.000000e+00 : f32
    %cst_5 = arith.constant 1.000000e+00 : f32
    %11 = vector.broadcast %cst_4 : f32 to vector<16x10xf32>
    %12 = arith.maximumf %11, %10 : vector<16x10xf32>
    %13 = vector.broadcast %cst_5 : f32 to vector<16x10xf32>
    %14 = arith.minimumf %13, %12 : vector<16x10xf32>
    %15 = tpu.concatenate %8, %14 in 1 : vector<16x10xf32>, vector<16x10xf32> -> vector<16x20xf32>
    %c0_6 = arith.constant 0 : index
    %c0_7 = arith.constant 0 : index
    %16 = vector.load %arg4[%c0_6, %c0_7] : memref<16x128xf32, #tpu.memory_space<vmem>>, vector<16x128xf32>
    %17 = vector.extract_strided_slice %16 {offsets = [0, 0], sizes = [16, 32], strides = [1, 1]} : vector<16x128xf32> to vector<16x32xf32>
    %18 = vector.extract_strided_slice %16 {offsets = [0, 64], sizes = [16, 32], strides = [1, 1]} : vector<16x128xf32> to vector<16x32xf32>
    %c0_8 = arith.constant 0 : index
    %c0_9 = arith.constant 0 : index
    %19 = vector.load %arg5[%c0_8, %c0_9] : memref<20x128xf32, #tpu.memory_space<vmem>>, vector<20x128xf32>
    %cst_10 = arith.constant dense<0.000000e+00> : vector<16x128xf32>
    %20 = tpu.matmul %15, %19, %cst_10 {dimension_numbers = #tpu.dot_dimension_numbers<[1], [0], [0], [1], [0, 0, 1, 1], [], []>} : vector<16x20xf32>, vector<20x128xf32>, vector<16x128xf32> -> vector<16x128xf32>
    %c0_11 = arith.constant 0 : index
    %c0_12 = arith.constant 0 : index
    %21 = vector.load %arg6[%c0_11, %c0_12] : memref<32x128xf32, #tpu.memory_space<vmem>>, vector<32x128xf32>
    %cst_13 = arith.constant dense<0.000000e+00> : vector<16x128xf32>
    %22 = tpu.matmul %17, %21, %cst_13 {dimension_numbers = #tpu.dot_dimension_numbers<[1], [0], [0], [1], [0, 0, 1, 1], [], []>} : vector<16x32xf32>, vector<32x128xf32>, vector<16x128xf32> -> vector<16x128xf32>
    %23 = arith.addf %20, %22 : vector<16x128xf32>
    %c0_14 = arith.constant 0 : index
    %c0_15 = arith.constant 0 : index
    %24 = vector.load %arg7[%c0_14, %c0_15] : memref<1x128xf32, #tpu.memory_space<vmem>>, vector<1x128xf32>
    %25 = vector.broadcast %24 : vector<1x128xf32> to vector<16x128xf32>
    %26 = arith.addf %23, %25 : vector<16x128xf32>
    %27 = arith.negf %26 : vector<16x128xf32>
    %28 = math.exp %27 : vector<16x128xf32>
    %cst_16 = arith.constant 1.000000e+00 : f32
    %29 = vector.broadcast %cst_16 : f32 to vector<16x128xf32>
    %30 = arith.addf %29, %28 : vector<16x128xf32>
    %31 = arith.divf %29, %30 : vector<16x128xf32>
    %32 = vector.extract_strided_slice %31 {offsets = [0, 0], sizes = [16, 32], strides = [1, 1]} : vector<16x128xf32> to vector<16x32xf32>
    %33 = vector.extract_strided_slice %31 {offsets = [0, 32], sizes = [16, 32], strides = [1, 1]} : vector<16x128xf32> to vector<16x32xf32>
    %34 = vector.extract_strided_slice %31 {offsets = [0, 64], sizes = [16, 32], strides = [1, 1]} : vector<16x128xf32> to vector<16x32xf32>
    %cst_17 = arith.constant 2.000000e+00 : f32
    %35 = vector.broadcast %cst_17 : f32 to vector<16x32xf32>
    %36 = arith.mulf %35, %34 : vector<16x32xf32>
    %cst_18 = arith.constant 1.000000e+00 : f32
    %37 = vector.broadcast %cst_18 : f32 to vector<16x32xf32>
    %38 = arith.subf %36, %37 : vector<16x32xf32>
    %39 = vector.extract_strided_slice %31 {offsets = [0, 96], sizes = [16, 32], strides = [1, 1]} : vector<16x128xf32> to vector<16x32xf32>
    %40 = arith.mulf %33, %18 : vector<16x32xf32>
    %41 = arith.mulf %32, %38 : vector<16x32xf32>
    %42 = arith.addf %40, %41 : vector<16x32xf32>
    %43 = math.tanh %42 : vector<16x32xf32>
    %44 = arith.mulf %39, %43 : vector<16x32xf32>
    %45 = vector.extract_strided_slice %16 {offsets = [0, 32], sizes = [16, 32], strides = [1, 1]} : vector<16x128xf32> to vector<16x32xf32>
    %46 = vector.extract_strided_slice %16 {offsets = [0, 96], sizes = [16, 32], strides = [1, 1]} : vector<16x128xf32> to vector<16x32xf32>
    %c0_19 = arith.constant 0 : index
    %c0_20 = arith.constant 0 : index
    %47 = vector.load %arg8[%c0_19, %c0_20] : memref<32x128xf32, #tpu.memory_space<vmem>>, vector<32x128xf32>
    %cst_21 = arith.constant dense<0.000000e+00> : vector<16x128xf32>
    %48 = tpu.matmul %44, %47, %cst_21 {dimension_numbers = #tpu.dot_dimension_numbers<[1], [0], [0], [1], [0, 0, 1, 1], [], []>} : vector<16x32xf32>, vector<32x128xf32>, vector<16x128xf32> -> vector<16x128xf32>
    %c0_22 = arith.constant 0 : index
    %c0_23 = arith.constant 0 : index
    %49 = vector.load %arg9[%c0_22, %c0_23] : memref<32x128xf32, #tpu.memory_space<vmem>>, vector<32x128xf32>
    %cst_24 = arith.constant dense<0.000000e+00> : vector<16x128xf32>
    %50 = tpu.matmul %45, %49, %cst_24 {dimension_numbers = #tpu.dot_dimension_numbers<[1], [0], [0], [1], [0, 0, 1, 1], [], []>} : vector<16x32xf32>, vector<32x128xf32>, vector<16x128xf32> -> vector<16x128xf32>
    %51 = arith.addf %48, %50 : vector<16x128xf32>
    %c0_25 = arith.constant 0 : index
    %c0_26 = arith.constant 0 : index
    %52 = vector.load %arg10[%c0_25, %c0_26] : memref<1x128xf32, #tpu.memory_space<vmem>>, vector<1x128xf32>
    %53 = vector.broadcast %52 : vector<1x128xf32> to vector<16x128xf32>
    %54 = arith.addf %51, %53 : vector<16x128xf32>
    %55 = arith.negf %54 : vector<16x128xf32>
    %56 = math.exp %55 : vector<16x128xf32>
    %cst_27 = arith.constant 1.000000e+00 : f32
    %57 = vector.broadcast %cst_27 : f32 to vector<16x128xf32>
    %58 = arith.addf %57, %56 : vector<16x128xf32>
    %59 = arith.divf %57, %58 : vector<16x128xf32>
    %60 = vector.extract_strided_slice %59 {offsets = [0, 0], sizes = [16, 32], strides = [1, 1]} : vector<16x128xf32> to vector<16x32xf32>
    %61 = vector.extract_strided_slice %59 {offsets = [0, 32], sizes = [16, 32], strides = [1, 1]} : vector<16x128xf32> to vector<16x32xf32>
    %62 = vector.extract_strided_slice %59 {offsets = [0, 64], sizes = [16, 32], strides = [1, 1]} : vector<16x128xf32> to vector<16x32xf32>
    %cst_28 = arith.constant 2.000000e+00 : f32
    %63 = vector.broadcast %cst_28 : f32 to vector<16x32xf32>
    %64 = arith.mulf %63, %62 : vector<16x32xf32>
    %cst_29 = arith.constant 1.000000e+00 : f32
    %65 = vector.broadcast %cst_29 : f32 to vector<16x32xf32>
    %66 = arith.subf %64, %65 : vector<16x32xf32>
    %67 = vector.extract_strided_slice %59 {offsets = [0, 96], sizes = [16, 32], strides = [1, 1]} : vector<16x128xf32> to vector<16x32xf32>
    %68 = arith.mulf %61, %46 : vector<16x32xf32>
    %69 = arith.mulf %60, %66 : vector<16x32xf32>
    %70 = arith.addf %68, %69 : vector<16x32xf32>
    %71 = math.tanh %70 : vector<16x32xf32>
    %72 = arith.mulf %67, %71 : vector<16x32xf32>
    %c0_30 = arith.constant 0 : index
    %c0_31 = arith.constant 0 : index
    %73 = vector.load %arg11[%c0_30, %c0_31] : memref<32x10xf32, #tpu.memory_space<vmem>>, vector<32x10xf32>
    %cst_32 = arith.constant dense<0.000000e+00> : vector<16x10xf32>
    %74 = tpu.matmul %72, %73, %cst_32 {dimension_numbers = #tpu.dot_dimension_numbers<[1], [0], [0], [1], [0, 0, 1, 1], [], []>} : vector<16x32xf32>, vector<32x10xf32>, vector<16x10xf32> -> vector<16x10xf32>
    %c0_33 = arith.constant 0 : index
    %c0_34 = arith.constant 0 : index
    %75 = vector.load %arg12[%c0_33, %c0_34] : memref<1x10xf32, #tpu.memory_space<vmem>>, vector<1x10xf32>
    %76 = vector.broadcast %75 : vector<1x10xf32> to vector<16x10xf32>
    %77 = arith.addf %74, %76 : vector<16x10xf32>
    %c0_35 = arith.constant 0 : index
    %c0_36 = arith.constant 0 : index
    %78 = vector.load %arg3[%c0_35, %c0_36] : memref<16x10xf32, #tpu.memory_space<vmem>>, vector<16x10xf32>
    %c0_37 = arith.constant 0 : index
    %79 = memref.load %arg1[%c0_37] : memref<1xf32, #tpu.memory_space<smem>>
    %cst_38 = arith.constant 1.000000e+00 : f32
    %80 = arith.mulf %cst_38, %79 : f32
    %81 = vector.broadcast %80 : f32 to vector<16x10xf32>
    %82 = arith.mulf %77, %81 : vector<16x10xf32>
    %83 = arith.addf %78, %82 : vector<16x10xf32>
    %c0_39 = arith.constant 0 : index
    %c0_40 = arith.constant 0 : index
    %84 = vector.load %arg13[%c0_39, %c0_40] : memref<16x10xf32, #tpu.memory_space<vmem>>, vector<16x10xf32>
    tpu.vector_store %arg13[%c0_39, %c0_40], %83 {strides = array<i32>} : memref<16x10xf32, #tpu.memory_space<vmem>>, vector<16x10xf32>,
    %85 = tpu.concatenate %44, %72, %42, %70 in 1 : vector<16x32xf32>, vector<16x32xf32>, vector<16x32xf32>, vector<16x32xf32> -> vector<16x128xf32>
    %c0_41 = arith.constant 0 : index
    %c0_42 = arith.constant 0 : index
    %86 = vector.load %arg14[%c0_41, %c0_42] : memref<16x128xf32, #tpu.memory_space<vmem>>, vector<16x128xf32>
    tpu.vector_store %arg14[%c0_41, %c0_42], %85 {strides = array<i32>} : memref<16x128xf32, #tpu.memory_space<vmem>>, vector<16x128xf32>,
    return
  }
  func.func @transform_0(%arg0: i32) -> i32 {
    %c0_i32 = arith.constant 0 : i32
    %c0_i32_0 = arith.constant 0 : i32
    return %c0_i32 : i32
  }
  func.func @transform_1(%arg0: i32) -> (i32, i32) {
    %c0_i32 = arith.constant 0 : i32
    %c0_i32_0 = arith.constant 0 : i32
    return %arg0, %c0_i32 : i32, i32
  }
  func.func @transform_2(%arg0: i32) -> (i32, i32) {
    %c0_i32 = arith.constant 0 : i32
    %c0_i32_0 = arith.constant 0 : i32
    return %arg0, %c0_i32 : i32, i32
  }
  func.func @transform_3(%arg0: i32) -> (i32, i32) {
    %c0_i32 = arith.constant 0 : i32
    %c0_i32_0 = arith.constant 0 : i32
    return %arg0, %c0_i32 : i32, i32
  }
  func.func @transform_4(%arg0: i32) -> (i32, i32) {
    %c0_i32 = arith.constant 0 : i32
    %c0_i32_0 = arith.constant 0 : i32
    %c0_i32_1 = arith.constant 0 : i32
    return %c0_i32, %c0_i32_0 : i32, i32
  }
  func.func @transform_5(%arg0: i32) -> (i32, i32) {
    %c0_i32 = arith.constant 0 : i32
    %c0_i32_0 = arith.constant 0 : i32
    %c0_i32_1 = arith.constant 0 : i32
    return %c0_i32, %c0_i32_0 : i32, i32
  }
  func.func @transform_6(%arg0: i32) -> (i32, i32) {
    %c0_i32 = arith.constant 0 : i32
    %c0_i32_0 = arith.constant 0 : i32
    %c0_i32_1 = arith.constant 0 : i32
    return %c0_i32, %c0_i32_0 : i32, i32
  }
  func.func @transform_7(%arg0: i32) -> (i32, i32) {
    %c0_i32 = arith.constant 0 : i32
    %c0_i32_0 = arith.constant 0 : i32
    %c0_i32_1 = arith.constant 0 : i32
    return %c0_i32, %c0_i32_0 : i32, i32
  }
  func.func @transform_8(%arg0: i32) -> (i32, i32) {
    %c0_i32 = arith.constant 0 : i32
    %c0_i32_0 = arith.constant 0 : i32
    %c0_i32_1 = arith.constant 0 : i32
    return %c0_i32, %c0_i32_0 : i32, i32
  }
  func.func @transform_9(%arg0: i32) -> (i32, i32) {
    %c0_i32 = arith.constant 0 : i32
    %c0_i32_0 = arith.constant 0 : i32
    %c0_i32_1 = arith.constant 0 : i32
    return %c0_i32, %c0_i32_0 : i32, i32
  }
  func.func @transform_10(%arg0: i32) -> (i32, i32) {
    %c0_i32 = arith.constant 0 : i32
    %c0_i32_0 = arith.constant 0 : i32
    %c0_i32_1 = arith.constant 0 : i32
    return %c0_i32, %c0_i32_0 : i32, i32
  }
  func.func @transform_11(%arg0: i32) -> (i32, i32) {
    %c0_i32 = arith.constant 0 : i32
    %c0_i32_0 = arith.constant 0 : i32
    %c0_i32_1 = arith.constant 0 : i32
    return %c0_i32, %c0_i32_0 : i32, i32
  }
  func.func @transform_12(%arg0: i32) -> (i32, i32) {
    %c0_i32 = arith.constant 0 : i32
    %c0_i32_0 = arith.constant 0 : i32
    return %arg0, %c0_i32 : i32, i32
  }
  func.func @transform_13(%arg0: i32) -> (i32, i32) {
    %c0_i32 = arith.constant 0 : i32
    %c0_i32_0 = arith.constant 0 : i32
    return %arg0, %c0_i32 : i32, i32
  }
}

</mosaic_0001>

<bundles_post_ra>
// kernel: forward.1
= control target key start
LH: loop header
LB: loop body
LE: loop exit
PB: predicated region body
PF: predicated region fallthrough
CT: control target
= control target key end

     0   :  { %vm173_vm0 = vcmask 1043456   ;;  %vm84_vm1 = vcmask 261120   ;;  %s842_s25 = smov 10   ;;  %s843_s29 = smov 96   ;;  %vm72_vm2 = vcmask 80896   ;;  %vm166_vm3 = vcmask 162816   ;;  %s1081_s1 = inlined_call_operand.vmem [shape: f32[16,10], index: 1, kind: input, shape index: {}]   ;;  %s1082_s5 = inlined_call_operand.vmem [shape: f32[32,128], index: 5, kind: input, shape index: {}]   ;;  %s1083_s4 = inlined_call_operand.vmem [shape: f32[20,128], index: 4, kind: input, shape index: {}]   ;;  %s1084_s3 = inlined_call_operand.vmem [shape: f32[16,128], index: 3, kind: input, shape index: {}]   ;;  %s1085_s6 = inlined_call_operand.vmem [shape: f32[1,128], index: 6, kind: input, shape index: {}]   ;;  %s1086_s8 = inlined_call_operand.vmem [shape: f32[32,128], index: 8, kind: input, shape index: {}]   ;;  %s1087_s7 = inlined_call_operand.vmem [shape: f32[32,128], index: 7, kind: input, shape index: {}]   ;;  %s1088_s9 = inlined_call_operand.vmem [shape: f32[1,128], index: 9, kind: input, shape index: {}]   ;;  %s1089_s10 = inlined_call_operand.vmem [shape: f32[32,10], index: 10, kind: input, shape index: {}]   ;;  %s1090_s13 = inlined_call_operand.vmem [shape: f32[16,128], index: 13, kind: output, shape index: {1}]   ;;  %s1091_s11 = inlined_call_operand.vmem [shape: f32[1,10], index: 11, kind: input, shape index: {}]   ;;  %s1092_s0 = inlined_call_operand.<no memory space> [shape: f32[1], index: 0, kind: input, shape index: {}]   ;;  %s1093_s2 = inlined_call_operand.vmem [shape: f32[16,10], index: 2, kind: input, shape index: {}, may-alias: {2,12}]   ;;  %s1094_s12 = inlined_call_operand.vmem [shape: f32[16,10], index: 12, kind: output, shape index: {0}, may-alias: {2,12}]  }
   0x1   :  { %v44_v0 = vld [vmem:[%s1081_s1] sm:$0xff]  ;;  %v45_v1 = vld [vmem:[%s1081_s1 + $0x8] sm:$0xff]  ;;  %v83_v2 = vld [vmem:[%s1082_s5 + $0x18] sm:$0xff]  ;;  %s844_s18 = smov 64   ;;  %s845_s20 = smov 32   ;;  %vm686_vm4 = vcmask 523264  }
   0x2   :  { %v58_v3 = vmul.f32 22026.465, %v44_v0  ;;  %757 = vmatprep.subr.mxu0 %v83_v2  ;;  %v59_v4 = vmul.f32 22026.465, %v45_v1  ;;  %v82_v5 = vld [vmem:[%s1082_s5 + $0x10] sm:$0xff]  ;;  %v81_v6 = vld [vmem:[%s1082_s5 + $0x8] sm:$0xff] }
   0x3   :  { %758 = vmatpush3.msra.mxu0 %v83_v2  ;;  %v79_v7 = vld [vmem:[%s1083_s4 + $0x10] sm:$0xf]  ;;  %v78_v9 = vld [vmem:[%s1083_s4 + $0x8] sm:$0xff]  ;;  %v80_v10 = vld [vmem:[%s1082_s5] sm:$0xff]  ;;  %v46_v15 = vand.u32 2147483647, %v44_v0 }
   0x4   :  { %v704_v8 = vclamps-f32 %v58_v3, 1.0  ;;  %759 = vmatprep.subr.mxu0 %v82_v5  ;;  %768 = vmatprep.subr.msk.mxu1 %vm173_vm0, %v79_v7  ;;  %v943_v11 = vld [vmem:[%s1084_s3] sm:$0xff]  ;;  %v705_v12 = vclamps-f32 %v59_v4, 1.0  ;;  %v948_v13 = vld [vmem:[%s1084_s3 + $0x8] sm:$0xff]  ;;  %v47_v16 = vand.u32 2147483647, %v45_v1 }
   0x5   :  { %760 = vmatpush3.msra.mxu0 %v82_v5  ;;  %769 = vmatpush3.msk.msra.mxu1 %vm173_vm0, %v79_v7  ;;  %v77_v14 = vld [vmem:[%s1083_s4] sm:$0xff]  ;;  %814 = vlog2.f32 %v46_v15  ;;  %v324_v48 = vld [vmem:[%s1086_s8 + $0x18] sm:$0xff]  ;;  %v323_v49 = vld [vmem:[%s1086_s8 + $0x10] sm:$0xff]  ;;  %vm689_vm5 = vcmask 785408  }
   0x6   :  { %66 = vrot.lane.b32.xlu0 %v704_v8, %s842_s25  ;;  %761 = vmatprep.subr.mxu0 %v81_v6  ;;  %816 = vlog2.f32 %v47_v16  ;;  %v711_v32 = vld [vmem:[%s1085_s6] ss:$0 sm:$0xff]  ;;  %v322_v52 = vld [vmem:[%s1086_s8 + $0x8] sm:$0xff]  ;;  %v320_v2 = vld [vmem:[%s1087_s7 + $0x18] sm:$0xff] }
   0x7   :  { %762 = vmatpush3.msra.mxu0 %v81_v6  ;;  %770 = vmatprep.subr.mxu1 %v78_v9  ;;  %v321_v53 = vld [vmem:[%s1086_s8] sm:$0xff]  ;;  %v319_v3 = vld [vmem:[%s1087_s7 + $0x10] sm:$0xff]  ;;  %v318_v6 = vld [vmem:[%s1087_s7 + $0x8] sm:$0xff] }
   0x8   :  { %763 = vmatprep.subr.mxu0 %v80_v10  ;;  %765 = vmatprep.mubr.msk.f32.mxu0 %vm84_vm1, %v943_v11  ;;  %v317_v7 = vld [vmem:[%s1087_s7] sm:$0xff] }
   0x9   :  { %764 = vmatpush3.msra.mxu0 %v80_v10  ;;  %771 = vmatpush3.msra.mxu1 %v78_v9 }
   0xa   :  { %68 = vrot.lane.b32.xlu0 %v705_v12, %s842_s25  ;;  %766 = vmatmul.mubr.msk.f32.vlgmr.msra.gmra.mxu0 %vm84_vm1, %v948_v13 }
   0xb   :  { %772 = vmatprep.subr.mxu1 %v77_v14  ;;  %788 = vmatprep.subr.mxu0 %v320_v2 }
   0xc   :  { %773 = vmatpush3.msra.mxu1 %v77_v14  ;;  %789 = vmatpush3.msra.mxu0 %v320_v2 }
   0xd   :  { %777 = vmatprep.subr.mxu1 %v324_v48  ;;  %790 = vmatprep.subr.mxu0 %v319_v3 }
   0xe   :  { %277 = vrot.lane.b32.xlu0 %v943_v11, %s843_s29  ;;  %791 = vmatpush3.msra.mxu0 %v319_v3 }
   0xf   :  { %792 = vmatprep.subr.mxu0 %v318_v6 }
  0x10   :  { %793 = vmatpush3.msra.mxu0 %v318_v6 }
  0x11   :  { %794 = vmatprep.subr.mxu0 %v317_v7 }
  0x12   :  { %v815_v17 = vpop.eup %814  ;;  %795 = vmatpush3.msra.mxu0 %v317_v7  ;;  %v725_v7 = vld [vmem:[%s1091_s11] ss:$0 sm:$0xff] }
  0x13   :  { %v49_v18 = vmul.f32 0.6931472, %v815_v17  ;;  %v817_v19 = vpop.eup %816 }
  0x14   :  { %v51_v21 = vmul.f32 0.6931472, %v817_v19 }
  0x15   :  { %v52_v20 = vmul.f32 0.1, %v49_v18  ;;  %v720_v18 = vld [vmem:[%s1088_s9] ss:$0 sm:$0xff] }
  0x16   :  { %v53_v23 = vmul.f32 0.1, %v51_v21 }
  0x17   :  { %v702_v22 = vclamps-f32 %v52_v20, 1.0 }
  0x18   :  { %v703_v26 = vclamps-f32 %v53_v23, 1.0 }
  0x78   :  { %v67_v24 = vpop.permute.xlu0 %66 }
  0x79   :  { %v73_v25 = vsel %vm72_vm2, %v702_v22, %v67_v24 }
  0x7a   :  { %774 = vmatprep.mubr.msk.f32.mxu1 %vm166_vm3, %v73_v25 }
  0x7c   :  { %v69_v27 = vpop.permute.xlu0 %68 }
  0x7d   :  { %v74_v28 = vsel %vm72_vm2, %v703_v26, %v69_v27 }
  0x7e   :  { %775 = vmatmul.mubr.msk.f32.vlgmr.msra.gmra.mxu1 %vm166_vm3, %v74_v28 }
  0x7f   :  { %778 = vmatpush3.msra.mxu1 %v324_v48 }
  0x80   :  { %v278_v29 = vpop.permute.xlu0 %277  ;;  %779 = vmatprep.subr.mxu1 %v323_v49 }
  0x81   :  { %785 = vmatprep.mubr.msk.f32.mxu1 %vm84_vm1, %v278_v29  ;;  %780 = vmatpush3.msra.mxu1 %v323_v49  ;;  %v557_v49 = vld [vmem:[%s1089_s10 + $0x18] sm:$0xff] }
  0x82   :  { %781 = vmatprep.subr.mxu1 %v322_v52 }
  0x83   :  { %782 = vmatpush3.msra.mxu1 %v322_v52  ;;  %v554_v52 = vld [vmem:[%s1089_s10] sm:$0xff] }
  0x84   :  { %783 = vmatprep.subr.mxu1 %v321_v53 }
  0x85   :  { %784 = vmatpush3.msra.mxu1 %v321_v53 }
  0x86   :  { %799 = vmatprep.subr.mxu1 %v557_v49 }
  0xca   :  { %v767_v30 = vpop.f32.mrf.mxu0 }
  0xcc   :  { %v157_v34 = vpop.f32.mrf.mxu0 }
 0x13e   :  { %v776_v31 = vpop.f32.mrf.mxu1 }
 0x13f   :  { %v249_v33 = vadd.f32 %v776_v31, %v767_v30 }
 0x140   :  { %v243_v35 = vpop.f32.mrf.mxu1 }
 0x141   :  { %v260_v36 = vadd.f32 %v711_v32, %v249_v33  ;;  %v244_v37 = vadd.f32 %v243_v35, %v157_v34 }
 0x143   :  { %v713_v38 = vmul.f32 -1.442695, %v260_v36  ;;  %v259_v39 = vadd.f32 %v711_v32, %v244_v37 }
 0x145   :  { %818 = vpow2.f32 %v713_v38  ;;  %v712_v40 = vmul.f32 -1.442695, %v259_v39 }
 0x147   :  { %820 = vpow2.f32 %v712_v40 }
 0x152   :  { %v819_v41 = vpop.eup %818 }
 0x153   :  { %v268_v42 = vadd.f32 1.0, %v819_v41 }
 0x154   :  { %v821_v43 = vpop.eup %820 }
 0x155   :  { %v267_v44 = vadd.f32 1.0, %v821_v43  ;;  %822 = vrcp.f32 %v268_v42 }
 0x157   :  { %824 = vrcp.f32 %v267_v44 }
 0x162   :  { %v823_v45 = vpop.eup %822 }
 0x163   :  { %v274_v51 = vmul.f32 2.0, %v823_v45 }
 0x164   :  { %v825_v46 = vpop.eup %824 }
 0x165   :  { %v273_v47 = vmul.f32 2.0, %v825_v46  ;;  %v715_v54 = vadd.f32 -1.0, %v274_v51  ;;  %v283_v60 = vmul.f32 %v825_v46, %v278_v29  ;;  %v555_v51 = vld [vmem:[%s1089_s10 + $0x8] sm:$0xff] }
 0x167   :  { %v714_v50 = vadd.f32 -1.0, %v273_v47 }
 0x169   :  { %287 = vrot.lane.b32.xlu1 %v714_v50, %s844_s18  ;;  %v556_v50 = vld [vmem:[%s1089_s10 + $0x10] sm:$0xff] }
 0x16d   :  { %289 = vrot.lane.b32.xlu1 %v715_v54, %s844_s18 }
 0x171   :  { %279 = vrot.lane.b32.xlu1 %v948_v13, %s843_s29 }
 0x1db   :  { %v288_v55 = vpop.permute.xlu1 %287 }
 0x1dc   :  { %v293_v56 = vmul.f32 %v825_v46, %v288_v55 }
 0x1de   :  { %297 = vrot.lane.b32.xlu0 %v293_v56, %s845_s20 }
 0x1df   :  { %v290_v57 = vpop.permute.xlu1 %289 }
 0x1e0   :  { %v294_v58 = vmul.f32 %v823_v45, %v290_v57 }
 0x1e2   :  { %299 = vrot.lane.b32.xlu1 %v294_v58, %s845_s20 }
 0x1e3   :  { %v280_v59 = vpop.permute.xlu1 %279 }
 0x1e4   :  { %786 = vmatmul.mubr.msk.f32.vlgmr.msra.gmra.mxu1 %vm84_vm1, %v280_v59  ;;  %v284_v63 = vmul.f32 %v823_v45, %v280_v59 }
 0x1e5   :  { %800 = vmatpush3.msra.mxu1 %v557_v49 }
 0x1e6   :  { %801 = vmatprep.subr.mxu1 %v556_v50 }
 0x1e7   :  { %802 = vmatpush3.msra.mxu1 %v556_v50 }
 0x1e8   :  { %803 = vmatprep.subr.mxu1 %v555_v51 }
 0x1e9   :  { %804 = vmatpush3.msra.mxu1 %v555_v51 }
 0x1ea   :  { %805 = vmatprep.subr.mxu1 %v554_v52 }
 0x1eb   :  { %806 = vmatpush3.msra.mxu1 %v554_v52 }
 0x250   :  { %v298_v61 = vpop.permute.xlu0 %297 }
 0x251   :  { %v984_v62 = vadd.f32 %v298_v61, %v283_v60 }
 0x253   :  { %826 = vtanh.f32 %v984_v62 }
 0x254   :  { %v300_v0 = vpop.permute.xlu1 %299 }
 0x255   :  { %v987_v1 = vadd.f32 %v300_v0, %v284_v63 }
 0x257   :  { %828 = vtanh.f32 %v987_v1 }
 0x260   :  { %v827_v4 = vpop.eup %826 }
 0x261   :  { %309 = vrot.lane.b32.xlu0 %v827_v4, %s844_s18 }
 0x264   :  { %v829_v5 = vpop.eup %828 }
 0x265   :  { %311 = vrot.lane.b32.xlu1 %v829_v5, %s844_s18 }
 0x2a4   :  { %v787_v16 = vpop.f32.mrf.mxu1 }
 0x2a6   :  { %v395_v20 = vpop.f32.mrf.mxu1 }
 0x2d3   :  { %v310_v8 = vpop.permute.xlu0 %309 }
 0x2d4   :  { %v315_v9 = vmul.f32 %v825_v46, %v310_v8 }
 0x2d6   :  { %406 = vrot.lane.b32.xlu0 %v315_v9, %s845_s20  ;;  %v653_v9 = vstv %s1092_s0 }
 0x2d7   :  { %v312_v10 = vpop.permute.xlu1 %311 }
 0x2d8   :  { %v316_v12 = vmul.f32 %v823_v45, %v312_v10 }
 0x2da   :  { %408 = vrot.lane.b32.xlu1 %v316_v12, %s845_s20  ;;  %v651_v12 = vld [vmem:[%s1093_s2 + $0x8] sm:$0xff] }
 0x348   :  { %v1006_v14 = vpop.permute.xlu0 %406 }
 0x349   :  { %796 = vmatprep.mubr.msk.f32.mxu0 %vm84_vm1, %v1006_v14 }
 0x34c   :  { %v1010_v15 = vpop.permute.xlu1 %408 }
 0x34d   :  { %797 = vmatmul.mubr.msk.f32.vlgmr.msra.gmra.mxu0 %vm84_vm1, %v1010_v15 }
 0x40d   :  { %v798_v17 = vpop.f32.mrf.mxu0 }
 0x40e   :  { %v486_v19 = vadd.f32 %v798_v17, %v787_v16  ;;  %v650_v17 = vld [vmem:[%s1093_s2] sm:$0xff] }
 0x40f   :  { %v480_v21 = vpop.f32.mrf.mxu0 }
 0x410   :  { %v497_v22 = vadd.f32 %v720_v18, %v486_v19  ;;  %v481_v23 = vadd.f32 %v480_v21, %v395_v20 }
 0x412   :  { %v722_v24 = vmul.f32 -1.442695, %v497_v22  ;;  %v496_v25 = vadd.f32 %v720_v18, %v481_v23 }
 0x414   :  { %830 = vpow2.f32 %v722_v24  ;;  %v721_v26 = vmul.f32 -1.442695, %v496_v25 }
 0x416   :  { %832 = vpow2.f32 %v721_v26 }
 0x421   :  { %v831_v27 = vpop.eup %830 }
 0x422   :  { %v505_v28 = vadd.f32 1.0, %v831_v27 }
 0x423   :  { %v833_v29 = vpop.eup %832 }
 0x424   :  { %834 = vrcp.f32 %v505_v28  ;;  %v504_v30 = vadd.f32 1.0, %v833_v29 }
 0x426   :  { %836 = vrcp.f32 %v504_v30 }
 0x431   :  { %v835_v31 = vpop.eup %834 }
 0x432   :  { %v511_v32 = vmul.f32 2.0, %v835_v31 }
 0x433   :  { %v837_v33 = vpop.eup %836 }
 0x434   :  { %v724_v34 = vadd.f32 -1.0, %v511_v32  ;;  %v510_v35 = vmul.f32 2.0, %v837_v33 }
 0x436   :  { %526 = vrot.lane.b32.xlu1 %v724_v34, %s844_s18  ;;  %v723_v36 = vadd.f32 -1.0, %v510_v35 }
 0x438   :  { %524 = vrot.lane.b32.xlu0 %v723_v36, %s844_s18 }
 0x43a   :  { %516 = vrot.lane.b32.xlu1 %v948_v13, %s844_s18 }
 0x43c   :  { %514 = vrot.lane.b32.xlu0 %v943_v11, %s844_s18 }
 0x4a8   :  { %v527_v37 = vpop.permute.xlu1 %526 }
 0x4a9   :  { %v531_v38 = vmul.f32 %v835_v31, %v527_v37 }
 0x4aa   :  { %v525_v39 = vpop.permute.xlu0 %524 }
 0x4ab   :  { %v530_v40 = vmul.f32 %v837_v33, %v525_v39  ;;  %536 = vrot.lane.b32.xlu1 %v531_v38, %s845_s20 }
 0x4ac   :  { %v517_v41 = vpop.permute.xlu1 %516 }
 0x4ad   :  { %534 = vrot.lane.b32.xlu0 %v530_v40, %s845_s20  ;;  %v521_v43 = vmul.f32 %v835_v31, %v517_v41 }
 0x4ae   :  { %v515_v42 = vpop.permute.xlu0 %514 }
 0x4af   :  { %v520_v45 = vmul.f32 %v837_v33, %v515_v42 }
 0x51d   :  { %v537_v44 = vpop.permute.xlu1 %536 }
 0x51e   :  { %v541_v46 = vadd.f32 %v537_v44, %v521_v43 }
 0x51f   :  { %v535_v47 = vpop.permute.xlu0 %534 }
 0x520   :  { %838 = vtanh.f32 %v541_v46  ;;  %v540_v13 = vadd.f32 %v535_v47, %v520_v45 }
 0x522   :  { %840 = vtanh.f32 %v540_v13 }
 0x52d   :  { %v839_v48 = vpop.eup %838 }
 0x52e   :  { %548 = vrot.lane.b32.xlu1 %v839_v48, %s844_s18 }
 0x52f   :  { %v841_v11 = vpop.eup %840 }
 0x530   :  { %546 = vrot.lane.b32.xlu0 %v841_v11, %s844_s18 }
 0x5a0   :  { %v549_v53 = vpop.permute.xlu1 %548 }
 0x5a1   :  { %v553_v54 = vmul.f32 %v835_v31, %v549_v53 }
 0x5a2   :  { %v547_v55 = vpop.permute.xlu0 %546 }
 0x5a3   :  { %v552_v56 = vmul.f32 %v837_v33, %v547_v55  ;;  %569 = vrot.lane.b32.xlu1 %v553_v54, %s845_s20 }
 0x5a5   :  { %567 = vrot.lane.b32.xlu0 %v552_v56, %s845_s20 }
 0x5a7   :  { %664 = vrot.lane.b32.xlu1 %v553_v54, %s844_s18 }
 0x5a9   :  { %670 = vrot.lane.b32.xlu0 %v984_v62, %s845_s20 }
 0x5ab   :  { %672 = vrot.lane.b32.xlu1 %v987_v1, %s845_s20 }
 0x5ad   :  { %662 = vrot.lane.b32.xlu0 %v552_v56, %s844_s18 }
 0x5af   :  { %680 = vrot.lane.b32.xlu1 %v541_v46, %s844_s18 }
 0x5b1   :  { %678 = vrot.lane.b32.xlu0 %v540_v13, %s844_s18 }
 0x615   :  { %v570_v57 = vpop.permute.xlu1 %569 }
 0x617   :  { %v568_v58 = vpop.permute.xlu0 %567 }
 0x618   :  { %807 = vmatprep.mubr.msk.f32.mxu1 %vm84_vm1, %v568_v58 }
 0x619   :  { %v665_v59 = vpop.permute.xlu1 %664  ;;  %808 = vmatmul.mubr.msk.f32.vlgmr.msra.gmra.mxu1 %vm84_vm1, %v570_v57 }
 0x61a   :  { %v685_v63 = vsel %vm84_vm1, %v1010_v15, %v665_v59 }
 0x61b   :  { %v671_v60 = vpop.permute.xlu0 %670 }
 0x61d   :  { %v673_v61 = vpop.permute.xlu1 %672 }
 0x61e   :  { %v688_v1 = vsel %vm686_vm4, %v685_v63, %v673_v61 }
 0x61f   :  { %v663_v62 = vpop.permute.xlu0 %662 }
 0x620   :  { %v684_v0 = vsel %vm84_vm1, %v1006_v14, %v663_v62 }
 0x621   :  { %v681_v2 = vpop.permute.xlu1 %680  ;;  %v687_v4 = vsel %vm686_vm4, %v684_v0, %v671_v60 }
 0x622   :  { %v691_v3 = vsel %vm689_vm5, %v688_v1, %v681_v2 }
 0x623   :  { %693 = vst [vmem:[%s1090_s13 + $0x8] sm:$0xff] %v691_v3  ;;  %v679_v5 = vpop.permute.xlu0 %678 }
 0x624   :  { %v690_v6 = vsel %vm689_vm5, %v687_v4, %v679_v5 }
 0x625   :  { %692 = vst [vmem:[%s1090_s13] sm:$0xff] %v690_v6 }
 0x6d9   :  { %v809_v8 = vpop.f32.mrf.mxu1 }
 0x6da   :  { %v647_v10 = vadd.f32 %v809_v8, %v725_v7 }
 0x6db   :  { %v641_v14 = vpop.f32.mrf.mxu1 }
 0x6dc   :  { %v655_v15 = vmul.f32 %v653_v9, %v647_v10  ;;  %v642_v16 = vadd.f32 %v725_v7, %v641_v14 }
 0x6de   :  { %v657_v18 = vadd.f32 %v655_v15, %v651_v12  ;;  %v654_v19 = vmul.f32 %v653_v9, %v642_v16 }
 0x6e0   :  { %659 = vst.msk [vmem:[%s1094_s12 + $0x8] sm:$0xff] %vm72_vm2, %v657_v18  ;;  %v656_v20 = vadd.f32 %v654_v19, %v650_v17 }
 0x6e2   :  { %658 = vst.msk [vmem:[%s1094_s12] sm:$0xff] %vm72_vm2, %v656_v20 }

</bundles_post_ra>
